<compile_context>
chip_gen: v6e
topology: v6e:2x2x1
jax: 0.10.0
libtpu: 0.0.40
codegen_flags: <defaults>
</compile_context>

<pallas_src>
import jax
import jax.numpy as jnp
from jax.experimental import pallas as pl
from jax.experimental.pallas import tpu as pltpu

# Synthetic stand-in for len(StropheParams.YEAR) (deterministic, in-script).
NUM_YEAR_CLASSES = 8


def _round_up(x, m):
    return ((x + m - 1) // m) * m


# ---------------------------------------------------------------------------
# Pallas kernel: tiled broadcast residual add
#   out[b, s, :] = hidden_states[b, s, :] + linear_up[b, :]
# ---------------------------------------------------------------------------
def _broadcast_add_kernel(hs_ref, lin_ref, out_ref):
    # hs_ref/out_ref: (B, tS, E); lin_ref: (B, 1, E); all in the native
    # activation dtype.  Broadcast along the sublane (sequence) axis.
    out_ref[...] = hs_ref[...] + lin_ref[...]


def _plan_seq_tile(B, S, E, itemsize, *, vmem_budget_bytes=28 << 20, min_steps=2):
    """Pick the sequence tile length tS.

    Lane-dense (full E), sublane-aligned, sized so double-buffered in+out tiles
    stay inside a v7x-safe VMEM budget (~28 MiB), and kept to >= min_steps grid
    steps (when S allows) so the v7x megacore can shard the "parallel" axis and
    the pipeline can overlap prefetch with stores.
    """
    sub = {1: 32, 2: 16}.get(itemsize, 8)          # sublane packing per dtype
    bytes_per_seq_row = 4 * B * E * itemsize       # 2 buffers x (in + out) per row
    t_budget = max(sub, (vmem_budget_bytes // bytes_per_seq_row) // sub * sub)
    t_steps = max(sub, _round_up(pl.cdiv(S, min_steps), sub))
    tS = min(t_budget, t_steps)
    if tS >= S:
        tS = S   # single full-extent block (full array dim is always legal)
    return tS


def broadcast_residual_add(hidden_states, linear_up, *, in_place=False):
    """hidden_states: (B, S, E) float dtype; linear_up: (B, E) f32.

    Returns hidden_states + linear_up[:, None, :] in hidden_states.dtype.
    With in_place=True the output aliases hidden_states (only profitable if the
    caller actually donates the buffer; XLA inserts a defensive copy otherwise).
    """
    B, S, E = hidden_states.shape
    dtype = hidden_states.dtype
    itemsize = jnp.dtype(dtype).itemsize

    tS = _plan_seq_tile(B, S, E, itemsize)
    grid = (pl.cdiv(S, tS),)                       # partial tail block is masked

    # Cast the per-batch bias row to the activation dtype once, in the wrapper.
    lin3 = linear_up.astype(dtype).reshape(B, 1, E)

    # Double-buffered in + out tiles, plus the tiny resident bias, plus margin.
    tile_bytes = 4 * B * tS * E * itemsize + 4 * B * E * itemsize
    vmem_limit = int(min(max(tile_bytes + (8 << 20), 32 << 20), 56 << 20))

    return pl.pallas_call(
        _broadcast_add_kernel,
        grid=grid,
        in_specs=[
            pl.BlockSpec((B, tS, E), lambda s: (0, s, 0)),   # streamed tiles
            pl.BlockSpec((B, 1, E), lambda s: (0, 0, 0)),    # resident bias rows
        ],
        out_specs=pl.BlockSpec((B, tS, E), lambda s: (0, s, 0)),
        out_shape=jax.ShapeDtypeStruct((B, S, E), dtype),
        input_output_aliases=({0: 0} if in_place else {}),
        compiler_params=pltpu.CompilerParams(
            dimension_semantics=("parallel",),
            vmem_limit_bytes=vmem_limit),
    )(hidden_states, lin3)


# ---------------------------------------------------------------------------
# Tiny head / scale linears — intentionally plain XLA (see design note above).
# ---------------------------------------------------------------------------
def _type_head_softmax(cls_hidden, w_pred_t, b_pred):
    # (B, E) @ (E, |YEAR|) + bias, then softmax over classes.
    logits = cls_hidden.astype(jnp.float32) @ w_pred_t + b_pred
    return jax.nn.softmax(logits, axis=-1)


def _linear_scale(type_prob, w_scale_t, b_scale):
    # (B, |YEAR|) @ (|YEAR|, output_size) + bias.
    return type_prob.astype(jnp.float32) @ w_scale_t + b_scale


# ---------------------------------------------------------------------------
# Module-level forward.  The `is None` checks mirror the PyTorch
# `self.context_ids != None` / `self.type_labels != None` branches.
# ---------------------------------------------------------------------------
def poet_type_forward(params, hidden_states, context_cls_hidden=None,
                      type_labels=None):
    B = hidden_states.shape[0]
    Y = params["w_pred_t"].shape[1]

    type_prob = jnp.zeros((B, Y), jnp.float32)
    attentions = None  # TODO(synk): would be GPT2Model attentions in the context path.

    if context_cls_hidden is not None:
        type_prob = _type_head_softmax(context_cls_hidden,
                                       params["w_pred_t"], params["b_pred"])

    indiv_loss = None
    if type_labels is not None:
        # torch.nn.CrossEntropyLoss applied to the (already softmaxed) type_prob
        # with probability targets, mean reduction — mirrors the module as
        # written (double softmax and all).
        log_sm = jax.nn.log_softmax(type_prob, axis=-1)
        indiv_loss = -jnp.mean(jnp.sum(type_labels.astype(jnp.float32) * log_sm,
                                       axis=-1))
        type_prob = type_labels.astype(jnp.float32)

    linear_up = _linear_scale(type_prob, params["w_scale_t"], params["b_scale"])

    # Pallas kernel: memory-bound streaming add, output in native dtype.
    out_hs = broadcast_residual_add(hidden_states, linear_up)

    # Matches: (hidden_states + linear_up[:, None, :],
    #           linear_up[None, :, None, :],
    #           (attentions, None))
    return (out_hs, linear_up[None, :, None, :], (attentions, None)), indiv_loss


# ---------------------------------------------------------------------------
# Deterministic parameter init (GPT2-style 0.02 normal), shapes from __init__.
# ---------------------------------------------------------------------------
def init_params(key, n_embd, output_size, n_year=NUM_YEAR_CLASSES):
    k1, k2, k3, k4 = jax.random.split(key, 4)
    w_pred = 0.02 * jax.random.normal(k1, (n_year, n_embd), jnp.float32)      # Linear(n_embd, |YEAR|)
    b_pred = 0.02 * jax.random.normal(k2, (n_year,), jnp.float32)
    w_scale = 0.02 * jax.random.normal(k3, (output_size, n_year), jnp.float32)  # Linear(|YEAR|, out)
    b_scale = 0.02 * jax.random.normal(k4, (output_size,), jnp.float32)
    return {
        "w_pred_t": w_pred.T,                        # (n_embd, |YEAR|)
        "b_pred": b_pred.reshape(1, n_year),         # (1, |YEAR|)
        "w_scale_t": w_scale.T,                      # (|YEAR|, output_size)
        "b_scale": b_scale.reshape(1, output_size),  # (1, output_size)
    }


if __name__ == "__main__":
    B, S, E = 2, 1024, 256        # batch, sequence, n_embd (small but tileable)
    OUT = E                       # output_size == n_embd (needed for residual add)

    key = jax.random.PRNGKey(0)
    k_hs, k_cls, k_par, k_odd = jax.random.split(key, 4)

    # Native-dtype activations (bf16), never upcast in HBM.
    hidden_states = jax.random.normal(k_hs, (B, S, E), jnp.float32).astype(jnp.bfloat16)
    # Stand-in for type_model(...)['hidden_states'][-1][:, 0, :]  (see TODO above).
    context_cls_hidden = jax.random.normal(k_cls, (B, E), jnp.float32)
    params = init_params(k_par, n_embd=E, output_size=OUT)

    # Default path: context_ids is None, type_labels is None.
    (out_hs0, lin0, extras0), loss0 = poet_type_forward(params, hidden_states)
    jax.block_until_ready((out_hs0, lin0))

    # Context path: classification head + softmax + scale + tiled residual add.
    (out_hs1, lin1, extras1), loss1 = poet_type_forward(
        params, hidden_states, context_cls_hidden=context_cls_hidden)
    jax.block_until_ready((out_hs1, lin1))

    # Labels path: CE loss then labels override before linear_scale.
    labels = jax.nn.one_hot(jnp.arange(B) % NUM_YEAR_CLASSES, NUM_YEAR_CLASSES,
                            dtype=jnp.float32)
    (out_hs2, lin2, extras2), loss2 = poet_type_forward(
        params, hidden_states, context_cls_hidden=context_cls_hidden,
        type_labels=labels)
    jax.block_until_ready((out_hs2, lin2, loss2))

    # ---- Numerical checks vs pure-JAX reference ----
    ref_prob = jax.nn.softmax(
        context_cls_hidden @ params["w_pred_t"] + params["b_pred"], axis=-1)
    ref_lin = ref_prob @ params["w_scale_t"] + params["b_scale"]
    ref_hs = (hidden_states.astype(jnp.float32) + ref_lin[:, None, :]
              ).astype(jnp.bfloat16)

    assert out_hs1.dtype == hidden_states.dtype          # native dtype preserved
    assert jnp.allclose(out_hs1.astype(jnp.float32), ref_hs.astype(jnp.float32),
                        atol=1e-2, rtol=1e-2)
    assert jnp.allclose(lin1[0, :, 0, :], ref_lin, atol=1e-5, rtol=1e-5)

    # Default path: zeros through linear_scale == bias broadcast.
    ref_hs0 = (hidden_states.astype(jnp.float32)
               + params["b_scale"].reshape(1, 1, OUT)).astype(jnp.bfloat16)
    assert jnp.allclose(lin0[0, :, 0, :],
                        jnp.broadcast_to(params["b_scale"], (B, OUT)),
                        atol=1e-6, rtol=1e-6)
    assert jnp.allclose(out_hs0.astype(jnp.float32), ref_hs0.astype(jnp.float32),
                        atol=1e-2, rtol=1e-2)

    # Labels path: linear_scale applied to the labels.
    ref_lin2 = labels @ params["w_scale_t"] + params["b_scale"]
    assert jnp.allclose(lin2[0, :, 0, :], ref_lin2, atol=1e-5, rtol=1e-5)
    assert bool(jnp.isfinite(loss2))

    # Awkward (non-divisible) sequence length: exercises the cdiv grid and the
    # masked partial tail block.
    S_odd = 200
    hs_odd = jax.random.normal(k_odd, (B, S_odd, E), jnp.float32).astype(jnp.bfloat16)
    out_odd = broadcast_residual_add(hs_odd, ref_lin)
    jax.block_until_ready(out_odd)
    ref_odd = (hs_odd.astype(jnp.float32) + ref_lin[:, None, :]).astype(jnp.bfloat16)
    assert jnp.allclose(out_odd.astype(jnp.float32), ref_odd.astype(jnp.float32),
                        atol=1e-2, rtol=1e-2)

    print("KERNEL_OK")
</pallas_src>

<mosaic_0001>
module attributes {stable_mosaic.version = 11 : i64} {
  func.func @_broadcast_add_kernel(%arg0: i32, %arg1: memref<2x512x256xbf16, #tpu.memory_space<vmem>>, %arg2: memref<2x1x256xbf16, #tpu.memory_space<vmem>>, %arg3: memref<2x512x256xbf16, #tpu.memory_space<vmem>>) attributes {dimension_semantics = [#tpu.dimension_semantics<parallel>], iteration_bounds = array<i64: 2>, scalar_prefetch = 0 : i64, scratch_operands = 0 : i64, tpu.core_type = #tpu.core_type<tc>, window_params = [{transform_indices = @transform_0, window_bounds = array<i64: 2, 512, 256>}, {pipeline_mode = #tpu.pipeline_mode<synchronous>, transform_indices = @transform_1, window_bounds = array<i64: 2, 1, 256>}, {transform_indices = @transform_2, window_bounds = array<i64: 2, 512, 256>}]} {
    %c0 = arith.constant 0 : index
    %c0_0 = arith.constant 0 : index
    %c0_1 = arith.constant 0 : index
    %0 = vector.load %arg1[%c0, %c0_0, %c0_1] : memref<2x512x256xbf16, #tpu.memory_space<vmem>>, vector<2x512x256xbf16>
    %c0_2 = arith.constant 0 : index
    %c0_3 = arith.constant 0 : index
    %c0_4 = arith.constant 0 : index
    %1 = vector.load %arg2[%c0_2, %c0_3, %c0_4] : memref<2x1x256xbf16, #tpu.memory_space<vmem>>, vector<2x1x256xbf16>
    %2 = vector.broadcast %1 : vector<2x1x256xbf16> to vector<2x512x256xbf16>
    %3 = arith.addf %0, %2 : vector<2x512x256xbf16>
    %c0_5 = arith.constant 0 : index
    %c0_6 = arith.constant 0 : index
    %c0_7 = arith.constant 0 : index
    %4 = vector.load %arg3[%c0_5, %c0_6, %c0_7] : memref<2x512x256xbf16, #tpu.memory_space<vmem>>, vector<2x512x256xbf16>
    tpu.vector_store %arg3[%c0_5, %c0_6, %c0_7], %3 {strides = array<i32>} : memref<2x512x256xbf16, #tpu.memory_space<vmem>>, vector<2x512x256xbf16>,
    return
  }
  func.func @transform_0(%arg0: i32) -> (i32, i32, i32) {
    %c0_i32 = arith.constant 0 : i32
    %c0_i32_0 = arith.constant 0 : i32
    %c0_i32_1 = arith.constant 0 : i32
    return %c0_i32, %arg0, %c0_i32_0 : i32, i32, i32
  }
  func.func @transform_1(%arg0: i32) -> (i32, i32, i32) {
    %c0_i32 = arith.constant 0 : i32
    %c0_i32_0 = arith.constant 0 : i32
    %c0_i32_1 = arith.constant 0 : i32
    %c0_i32_2 = arith.constant 0 : i32
    return %c0_i32, %c0_i32_0, %c0_i32_1 : i32, i32, i32
  }
  func.func @transform_2(%arg0: i32) -> (i32, i32, i32) {
    %c0_i32 = arith.constant 0 : i32
    %c0_i32_0 = arith.constant 0 : i32
    %c0_i32_1 = arith.constant 0 : i32
    return %c0_i32, %arg0, %c0_i32_0 : i32, i32, i32
  }
}

</mosaic_0001>

<bundles_post_ra>
// kernel: tpu_custom_call.1
= control target key start
LH: loop header
LB: loop body
LE: loop exit
PB: predicated region body
PF: predicated region fallthrough
CT: control target
= control target key end

     0   :  { %7 = vsyncpa [#allocation3], 0  ;;  %s1659_s0 = inlined_call_operand.hbm [shape: bf16[2,1024,256], index: 0, kind: input, shape index: {}]   ;;  %s1660_s1 = inlined_call_operand.vmem [shape: bf16[2,1,256], index: 1, kind: input, shape index: {}]   ;;  %s1661_s2 = inlined_call_operand.hbm [shape: bf16[2,1024,256], index: 2, kind: output, shape index: {}]  }
   0x1   :  { %9 = vsyncpa [#allocation3 + $0x1], 0 }
   0x2   :  { %10 = vsyncpa [#allocation4], 0 }
   0x3   :  { %12 = vsyncpa [#allocation4 + $0x1], 0  ;;  %s936_s9 = smov 0   ;;  %s938_s10 = smov 0  }
   0x4   :  { %s940_s11 = smov 0   ;;  %s942_s12 = smov 0  }
   0x5 LB: > { %s957_s13 = sadd.s32 4294967295, %s905_s12   ;;  %s773_s14 = sadd.s32 4294967294, %s905_s12   ;;  %s905_s12 = sphi %s942_s12, %s1669_s12   ;;  %s901_s11 = sphi %s940_s11, %s1668_s11   ;;  %s897_s10 = sphi %s938_s10, %s1667_s10   ;;  %s893_s9 = sphi %s936_s9, %s1666_s9  }
   0x6   : > { %s961_s15 = sadd.s32 1, %s905_s12   ;;  %s25_s16 = sadd.s32 1, %s901_s11 }
   0x7   : > { %s22_s17 = ssub.s32 %s905_s12, %s961_s15  ;;  %p32_p0 = scmp.ne.s32.totalorder %s901_s11, %s897_s10 }
   0x8   : > { %p23_p1 = scmp.eq.s32.totalorder %s22_s17, 0  ;;  %p33_p2 = scmp.eq.s32.totalorder %s905_s12, 0 }
   0x9   : > { %p38_p3 = scmp.ne.s32.totalorder %s897_s10, %s893_s9  ;;  %p39_p4 = scmp.eq.s32.totalorder %s957_s13, 0 }
   0xa   : > { %s973_s18 = scalar_select %p23_p1, %s901_s11, %s25_s16  }
   0xb   : > { %p975_p5 = por %p33_p2, %p32_p0  ;;  %p979_p6 = por %p39_p4, %p38_p3 }
   0xc   : > { %p83_p7 = scmp.eq.s32.totalorder %s957_s13, 1  ;;  %p89_p8 = scmp.eq.s32.totalorder %s773_s14, 1 }
   0xd   : > { %p775_p11 = scmp.ge.s32.totalorder %s905_s12, 2 }
   0xe   : > { %p984_p9 = por %p83_p7, %p32_p0  ;;  %p988_p10 = por %p89_p8, %p38_p3 }
   0xf   : > { %108 = sbr.rel (%p775_p11) target bundleno = 33 (0x21), region = 20 }
  0x14   : > { %s112_s23 = sand.u32 1, %s901_s11   ;;  %s796_s24 = sshll.u32 %s905_s12, 13 }
  0x15   : > { %s776_s25 = sshll.u32 %s112_s23, 10  ;;  %s123_s28 = scalar_lea.hbm %s1659_s0, %s796_s24 }
  0x16   : > { %s799_s29 = scalar_select %p975_p5, [#allocation0], [#allocation10] }
  0x17   : > { %s116_s30 = scalar_lea.vmem [#allocation2], %s776_s25  ;;  %s907_s5 = smov 16384  }
  0x18   : > { %s136_s3 = sshll.u32 %s116_s30, 4  ;;  %s128_s4 = sld [smem:[%s799_s29]]   ;;  %s137_s3 = int_to_ptr.vmem [resolvable:$true] %s136_s3 }
  0x19   : > { %800 = sst [smem:[#allocation7]] (%p975_p5), %s907_s5  ;;  %s908_s6 = smov 8192  }
  0x1a   : > { %801 = sst [smem:[#allocation7 + $0x1]] (%p975_p5), %s908_s6  ;;  %s909_s7 = smov 64  }
  0x1b   : > { %802 = sst [smem:[#allocation7 + $0x2]] (%p975_p5), %s909_s7  ;;  %s910_s8 = smov 128  }
  0x1c   : > { %803 = sst [smem:[#allocation7 + $0x3]] (%p975_p5), %s910_s8  ;;  %s911_s16 = smov 8  }
  0x1d   : > { %804 = sst [smem:[#allocation7 + $0x4]] (%p975_p5), %s910_s8  ;;  %s113_s24 = scalar_lea.sflag [#allocation3], %s112_s23 }
  0x1e   : > { %s780_s14 = sshll.u32 %s128_s4, 26  ;;  %805 = sst [smem:[#allocation7 + $0x5]] (%p975_p5), %s911_s16 }
  0x1f   : > { %s781_s17 = sadd.s32 134217728, %s780_s14  ;;  %s912_s25 = smov 131072  }
  0x20   : > { %806 = dma.general (%p975_p5), %s123_s28, 16384, %s137_s3, %s113_s24, %s912_s25, [#allocation7], %s781_s17, 0  }
  0x21 PF: > { %p782_p12 = scmp.ge.s32.totalorder %s905_s12, 1  ;;  %p157_p13 = scmp.lt.s32.totalorder %s905_s12, 3 }
  0x23   : > { %p158_p0 = pnand %p782_p12, %p157_p13 }
  0x24   : > { %s1019_s26 = sand.u32 (!%p158_p0), 1, %s897_s10  }
  0x25   : > { %161 = sbr.rel (%p158_p0) target bundleno = 133 (0x85), region = 28  ;;  %s783_s27 = sshll.u32 (!%p158_p0), %s1019_s26, 10 }
  0x26   : > { %s164_s29 = scalar_lea.sflag (!%p158_p0), [#allocation3], %s1019_s26  ;;  %s1025_s23 = scalar_lea.vmem (!%p158_p0), [#allocation2], %s783_s27 }
  0x2a   : > { %884 = dma.done.wait (%p979_p6), %s164_s29, 16384  }
  0x2b   : > { %886 = vsyncadd (%p979_p6), %s164_s29, 4294950912  ;;  %v333_v0 = vlaneseq  ;;  %v913_v1 = vmov 1966171168   ;;  %v190_v14 = vld [vmem:[%s1025_s23] sm:$0xff]  ;;  %v191_v15 = vld [vmem:[%s1025_s23 + $0x8] sm:$0xff]  ;;  %s1106_s20 = scalar_lea.vmem [#allocation5], %s783_s27 }
  0x2c   : > { %v331_v2 = vunpack.c.l.s4 %v913_v1  ;;  %v785_v6 = vld.sshfl [vmem:[%s1660_s1] sm:$0x11 pattern:$0x75316420]  ;;  %v192_v16 = vld [vmem:[%s1025_s23 + $0x10] sm:$0xff]  ;;  %v193_v17 = vld [vmem:[%s1025_s23 + $0x18] sm:$0xff] }
  0x2d   : > { %v334_v3 = vshrl.u32 %v333_v0, 7  ;;  %v329_v7 = vcombine.high %v785_v6, %v785_v6  ;;  %v194_v19 = vld [vmem:[%s1025_s23 + $0x20] sm:$0xff]  ;;  %v195_v20 = vld [vmem:[%s1025_s23 + $0x28] sm:$0xff]  ;;  %v196_v21 = vld [vmem:[%s1025_s23 + $0x30] sm:$0xff]  ;;  %s663_s4 = scalar_lea.sflag [#allocation4], %s1019_s26 }
  0x2e   : > { %v332_v4 = vunpack.c.0.s8 %v331_v2  ;;  %v197_v22 = vld [vmem:[%s1025_s23 + $0x38] sm:$0xff]  ;;  %v198_v23 = vld [vmem:[%s1025_s23 + $0x40] sm:$0xff]  ;;  %v199_v24 = vld [vmem:[%s1025_s23 + $0x48] sm:$0xff] }
  0x2f   : > { %v1037_v9 = vsub.s32 0, %v334_v3  ;;  %v200_v25 = vld [vmem:[%s1025_s23 + $0x50] sm:$0xff]  ;;  %v201_v26 = vld [vmem:[%s1025_s23 + $0x58] sm:$0xff]  ;;  %v202_v28 = vld [vmem:[%s1025_s23 + $0x60] sm:$0xff] }
  0x30   : > { %v1031_v5 = vsub.s32 %v332_v4, %v334_v3  ;;  %v203_v29 = vld [vmem:[%s1025_s23 + $0x68] sm:$0xff]  ;;  %v204_v30 = vld [vmem:[%s1025_s23 + $0x70] sm:$0xff]  ;;  %v205_v31 = vld [vmem:[%s1025_s23 + $0x78] sm:$0xff] }
  0x31   : > { %v1061_v32 = vld [vmem:[%s1025_s23 + $0x80] sm:$0xff]  ;;  %v1064_v33 = vld [vmem:[%s1025_s23 + $0x88] sm:$0xff]  ;;  %v1067_v34 = vld [vmem:[%s1025_s23 + $0x90] sm:$0xff] }
  0x32   : > { %v336_v8 = vrot.slane %v785_v6, %v1031_v5  ;;  %v343_v10 = vrot.slane %v329_v7, %v1031_v5  ;;  %v1070_v35 = vld [vmem:[%s1025_s23 + $0x98] sm:$0xff]  ;;  %v1077_v40 = vld [vmem:[%s1025_s23 + $0xa0] sm:$0xff]  ;;  %v1080_v41 = vld [vmem:[%s1025_s23 + $0xa8] sm:$0xff] }
  0x33   : > { %v1083_v42 = vld [vmem:[%s1025_s23 + $0xb0] sm:$0xff]  ;;  %v1086_v43 = vld [vmem:[%s1025_s23 + $0xb8] sm:$0xff]  ;;  %v1093_v48 = vld [vmem:[%s1025_s23 + $0xc0] sm:$0xff] }
  0x34   : > { %v367_v11 = vpack.i.b16 %v336_v8, %v336_v8  ;;  %v374_v13 = vpack.i.b16 %v343_v10, %v343_v10  ;;  %v1096_v49 = vld [vmem:[%s1025_s23 + $0xc8] sm:$0xff]  ;;  %v1099_v50 = vld [vmem:[%s1025_s23 + $0xd0] sm:$0xff]  ;;  %v1102_v51 = vld [vmem:[%s1025_s23 + $0xd8] sm:$0xff] }
  0x35   : > { %v1117_v56 = vld [vmem:[%s1025_s23 + $0xe0] sm:$0xff]  ;;  %v1120_v57 = vld [vmem:[%s1025_s23 + $0xe8] sm:$0xff]  ;;  %v1123_v58 = vld [vmem:[%s1025_s23 + $0xf0] sm:$0xff] }
  0x36   : > { %v372_v12 = vrot.slane %v367_v11, %v1037_v9  ;;  %v379_v18 = vrot.slane %v374_v13, %v1037_v9  ;;  %v1126_v59 = vld [vmem:[%s1025_s23 + $0xf8] sm:$0xff]  ;;  %v1137_v0 = vld [vmem:[%s1025_s23 + $0x100] sm:$0xff]  ;;  %v1140_v1 = vld [vmem:[%s1025_s23 + $0x108] sm:$0xff] }
  0x37   : > { %v1143_v2 = vld [vmem:[%s1025_s23 + $0x110] sm:$0xff]  ;;  %v1146_v3 = vld [vmem:[%s1025_s23 + $0x118] sm:$0xff]  ;;  %v1161_v10 = vld [vmem:[%s1025_s23 + $0x120] sm:$0xff] }
  0x38   : > { %v1054_v27 = vcombine.low %v372_v12, %v379_v18  ;;  %v1164_v11 = vld [vmem:[%s1025_s23 + $0x128] sm:$0xff]  ;;  %v1167_v12 = vld [vmem:[%s1025_s23 + $0x130] sm:$0xff]  ;;  %v1170_v13 = vld [vmem:[%s1025_s23 + $0x138] sm:$0xff] }
  0x39   : > { %v1185_v18 = vld [vmem:[%s1025_s23 + $0x140] sm:$0xff] }
  0x3a   : > { %v406_v36 = vadd.bf16 %v1054_v27, %v190_v14  ;;  %v407_v37 = vadd.bf16 %v1054_v27, %v191_v15  ;;  %v408_v38 = vadd.bf16 %v1054_v27, %v192_v16  ;;  %v409_v39 = vadd.bf16 %v1054_v27, %v193_v17 }
  0x3b   : > { %v410_v44 = vadd.bf16 %v1054_v27, %v194_v19  ;;  %v411_v45 = vadd.bf16 %v1054_v27, %v195_v20  ;;  %v412_v46 = vadd.bf16 %v1054_v27, %v196_v21  ;;  %v413_v47 = vadd.bf16 %v1054_v27, %v197_v22  ;;  %v1188_v19 = vld [vmem:[%s1025_s23 + $0x148] sm:$0xff]  ;;  %v1191_v20 = vld [vmem:[%s1025_s23 + $0x150] sm:$0xff] }
  0x3c   : > { %534 = vst [vmem:[%s1106_s20] sm:$0xff] %v406_v36  ;;  %535 = vst [vmem:[%s1106_s20 + $0x8] sm:$0xff] %v407_v37  ;;  %v414_v52 = vadd.bf16 %v1054_v27, %v198_v23  ;;  %v415_v53 = vadd.bf16 %v1054_v27, %v199_v24  ;;  %v416_v54 = vadd.bf16 %v1054_v27, %v200_v25  ;;  %v233_v25 = vld [vmem:[%s1025_s23 + $0x158] sm:$0xff] }
  0x3d   : > { %536 = vst [vmem:[%s1106_s20 + $0x10] sm:$0xff] %v408_v38  ;;  %537 = vst [vmem:[%s1106_s20 + $0x18] sm:$0xff] %v409_v39  ;;  %v417_v55 = vadd.bf16 %v1054_v27, %v201_v26  ;;  %v418_v60 = vadd.bf16 %v1054_v27, %v202_v28  ;;  %v419_v61 = vadd.bf16 %v1054_v27, %v203_v29  ;;  %v1207_v26 = vld [vmem:[%s1025_s23 + $0x160] sm:$0xff]  ;;  %v1210_v28 = vld [vmem:[%s1025_s23 + $0x168] sm:$0xff] }
  0x3e   : > { %538 = vst [vmem:[%s1106_s20 + $0x20] sm:$0xff] %v410_v44  ;;  %539 = vst [vmem:[%s1106_s20 + $0x28] sm:$0xff] %v411_v45  ;;  %v420_v62 = vadd.bf16 %v1054_v27, %v204_v30  ;;  %v421_v63 = vadd.bf16 %v1054_v27, %v205_v31  ;;  %v422_v4 = vadd.bf16 %v1054_v27, %v1061_v32 }
  0x3f   : > { %540 = vst [vmem:[%s1106_s20 + $0x30] sm:$0xff] %v412_v46  ;;  %541 = vst [vmem:[%s1106_s20 + $0x38] sm:$0xff] %v413_v47  ;;  %v423_v6 = vadd.bf16 %v1054_v27, %v1064_v33  ;;  %v424_v7 = vadd.bf16 %v1054_v27, %v1067_v34  ;;  %v425_v8 = vadd.bf16 %v1054_v27, %v1070_v35  ;;  %v236_v33 = vld [vmem:[%s1025_s23 + $0x170] sm:$0xff]  ;;  %v237_v34 = vld [vmem:[%s1025_s23 + $0x178] sm:$0xff] }
  0x40   : > { %542 = vst [vmem:[%s1106_s20 + $0x40] sm:$0xff] %v414_v52  ;;  %543 = vst [vmem:[%s1106_s20 + $0x48] sm:$0xff] %v415_v53  ;;  %v426_v14 = vadd.bf16 %v1054_v27, %v1077_v40  ;;  %v427_v15 = vadd.bf16 %v1054_v27, %v1080_v41  ;;  %v428_v16 = vadd.bf16 %v1054_v27, %v1083_v42  ;;  %v1227_v35 = vld [vmem:[%s1025_s23 + $0x180] sm:$0xff]  ;;  %v239_v40 = vld [vmem:[%s1025_s23 + $0x188] sm:$0xff] }
  0x41   : > { %544 = vst [vmem:[%s1106_s20 + $0x50] sm:$0xff] %v416_v54  ;;  %545 = vst [vmem:[%s1106_s20 + $0x58] sm:$0xff] %v417_v55  ;;  %v429_v17 = vadd.bf16 %v1054_v27, %v1086_v43  ;;  %v430_v21 = vadd.bf16 %v1054_v27, %v1093_v48  ;;  %v431_v22 = vadd.bf16 %v1054_v27, %v1096_v49  ;;  %v240_v41 = vld [vmem:[%s1025_s23 + $0x190] sm:$0xff]  ;;  %v241_v42 = vld [vmem:[%s1025_s23 + $0x198] sm:$0xff] }
  0x42   : > { %546 = vst [vmem:[%s1106_s20 + $0x60] sm:$0xff] %v418_v60  ;;  %547 = vst [vmem:[%s1106_s20 + $0x68] sm:$0xff] %v419_v61  ;;  %v432_v23 = vadd.bf16 %v1054_v27, %v1099_v50  ;;  %v433_v24 = vadd.bf16 %v1054_v27, %v1102_v51  ;;  %v434_v29 = vadd.bf16 %v1054_v27, %v1117_v56  ;;  %v242_v47 = vld [vmem:[%s1025_s23 + $0x1a0] sm:$0xff]  ;;  %v243_v48 = vld [vmem:[%s1025_s23 + $0x1a8] sm:$0xff] }
  0x43   : > { %548 = vst [vmem:[%s1106_s20 + $0x70] sm:$0xff] %v420_v62  ;;  %549 = vst [vmem:[%s1106_s20 + $0x78] sm:$0xff] %v421_v63  ;;  %v435_v30 = vadd.bf16 %v1054_v27, %v1120_v57  ;;  %v436_v31 = vadd.bf16 %v1054_v27, %v1123_v58  ;;  %v437_v32 = vadd.bf16 %v1054_v27, %v1126_v59  ;;  %v244_v49 = vld [vmem:[%s1025_s23 + $0x1b0] sm:$0xff]  ;;  %v245_v54 = vld [vmem:[%s1025_s23 + $0x1b8] sm:$0xff] }
  0x44   : > { %550 = vst [vmem:[%s1106_s20 + $0x80] sm:$0xff] %v422_v4  ;;  %551 = vst [vmem:[%s1106_s20 + $0x88] sm:$0xff] %v423_v6  ;;  %v438_v36 = vadd.bf16 %v1054_v27, %v1137_v0  ;;  %v439_v37 = vadd.bf16 %v1054_v27, %v1140_v1  ;;  %v440_v38 = vadd.bf16 %v1054_v27, %v1143_v2  ;;  %v246_v55 = vld [vmem:[%s1025_s23 + $0x1c0] sm:$0xff]  ;;  %v247_v56 = vld [vmem:[%s1025_s23 + $0x1c8] sm:$0xff] }
  0x45   : > { %552 = vst [vmem:[%s1106_s20 + $0x90] sm:$0xff] %v424_v7  ;;  %553 = vst [vmem:[%s1106_s20 + $0x98] sm:$0xff] %v425_v8  ;;  %v441_v39 = vadd.bf16 %v1054_v27, %v1146_v3  ;;  %v442_v43 = vadd.bf16 %v1054_v27, %v1161_v10  ;;  %v443_v44 = vadd.bf16 %v1054_v27, %v1164_v11  ;;  %v248_v61 = vld [vmem:[%s1025_s23 + $0x1d0] sm:$0xff]  ;;  %v249_v62 = vld [vmem:[%s1025_s23 + $0x1d8] sm:$0xff] }
  0x46   : > { %554 = vst [vmem:[%s1106_s20 + $0xa0] sm:$0xff] %v426_v14  ;;  %555 = vst [vmem:[%s1106_s20 + $0xa8] sm:$0xff] %v427_v15  ;;  %v444_v45 = vadd.bf16 %v1054_v27, %v1167_v12  ;;  %v445_v46 = vadd.bf16 %v1054_v27, %v1170_v13  ;;  %v446_v50 = vadd.bf16 %v1054_v27, %v1185_v18  ;;  %v250_v63 = vld [vmem:[%s1025_s23 + $0x1e0] sm:$0xff]  ;;  %v251_v4 = vld [vmem:[%s1025_s23 + $0x1e8] sm:$0xff] }
  0x47   : > { %556 = vst [vmem:[%s1106_s20 + $0xb0] sm:$0xff] %v428_v16  ;;  %557 = vst [vmem:[%s1106_s20 + $0xb8] sm:$0xff] %v429_v17  ;;  %v447_v51 = vadd.bf16 %v1054_v27, %v1188_v19  ;;  %v448_v52 = vadd.bf16 %v1054_v27, %v1191_v20  ;;  %v449_v53 = vadd.bf16 %v1054_v27, %v233_v25  ;;  %v252_v6 = vld [vmem:[%s1025_s23 + $0x1f0] sm:$0xff]  ;;  %v253_v7 = vld [vmem:[%s1025_s23 + $0x1f8] sm:$0xff] }
  0x48   : > { %558 = vst [vmem:[%s1106_s20 + $0xc0] sm:$0xff] %v430_v21  ;;  %559 = vst [vmem:[%s1106_s20 + $0xc8] sm:$0xff] %v431_v22  ;;  %v450_v57 = vadd.bf16 %v1054_v27, %v1207_v26  ;;  %v451_v58 = vadd.bf16 %v1054_v27, %v1210_v28  ;;  %v452_v59 = vadd.bf16 %v1054_v27, %v236_v33  ;;  %v786_v13 = vld.sshfl [vmem:[%s1660_s1 + $0x2] sm:$0x11 pattern:$0x75316420] }
  0x49   : > { %560 = vst [vmem:[%s1106_s20 + $0xd0] sm:$0xff] %v432_v23  ;;  %561 = vst [vmem:[%s1106_s20 + $0xd8] sm:$0xff] %v433_v24  ;;  %v453_v60 = vadd.bf16 %v1054_v27, %v237_v34  ;;  %v454_v0 = vadd.bf16 %v1054_v27, %v1227_v35  ;;  %v455_v1 = vadd.bf16 %v1054_v27, %v239_v40  ;;  %v254_v28 = vld [vmem:[%s1025_s23 + $0x200] sm:$0xff]  ;;  %v260_v34 = vld [vmem:[%s1025_s23 + $0x230] sm:$0xff] }
  0x4a   : > { %562 = vst [vmem:[%s1106_s20 + $0xe0] sm:$0xff] %v434_v29  ;;  %563 = vst [vmem:[%s1106_s20 + $0xe8] sm:$0xff] %v435_v30  ;;  %v456_v2 = vadd.bf16 %v1054_v27, %v240_v41  ;;  %v457_v3 = vadd.bf16 %v1054_v27, %v241_v42  ;;  %v458_v8 = vadd.bf16 %v1054_v27, %v242_v47  ;;  %v255_v29 = vld [vmem:[%s1025_s23 + $0x208] sm:$0xff]  ;;  %v256_v30 = vld [vmem:[%s1025_s23 + $0x210] sm:$0xff] }
  0x4b   : > { %564 = vst [vmem:[%s1106_s20 + $0xf0] sm:$0xff] %v436_v31  ;;  %565 = vst [vmem:[%s1106_s20 + $0xf8] sm:$0xff] %v437_v32  ;;  %v459_v10 = vadd.bf16 %v1054_v27, %v243_v48  ;;  %v460_v11 = vadd.bf16 %v1054_v27, %v244_v49  ;;  %v461_v12 = vadd.bf16 %v1054_v27, %v245_v54  ;;  %v257_v31 = vld [vmem:[%s1025_s23 + $0x218] sm:$0xff]  ;;  %v258_v33 = vld [vmem:[%s1025_s23 + $0x220] sm:$0xff] }
  0x4c   : > { %566 = vst [vmem:[%s1106_s20 + $0x100] sm:$0xff] %v438_v36  ;;  %567 = vst [vmem:[%s1106_s20 + $0x108] sm:$0xff] %v439_v37  ;;  %v462_v14 = vadd.bf16 %v1054_v27, %v246_v55  ;;  %v463_v15 = vadd.bf16 %v1054_v27, %v247_v56  ;;  %v464_v16 = vadd.bf16 %v1054_v27, %v248_v61  ;;  %v261_v35 = vld [vmem:[%s1025_s23 + $0x238] sm:$0xff]  ;;  %v262_v36 = vld [vmem:[%s1025_s23 + $0x240] sm:$0xff] }
  0x4d   : > { %568 = vst [vmem:[%s1106_s20 + $0x110] sm:$0xff] %v440_v38  ;;  %569 = vst [vmem:[%s1106_s20 + $0x118] sm:$0xff] %v441_v39  ;;  %v465_v17 = vadd.bf16 %v1054_v27, %v249_v62  ;;  %v466_v18 = vadd.bf16 %v1054_v27, %v250_v63  ;;  %v467_v19 = vadd.bf16 %v1054_v27, %v251_v4  ;;  %v263_v37 = vld [vmem:[%s1025_s23 + $0x248] sm:$0xff]  ;;  %v264_v38 = vld [vmem:[%s1025_s23 + $0x250] sm:$0xff] }
  0x4e   : > { %570 = vst [vmem:[%s1106_s20 + $0x120] sm:$0xff] %v442_v43  ;;  %571 = vst [vmem:[%s1106_s20 + $0x128] sm:$0xff] %v443_v44  ;;  %v468_v20 = vadd.bf16 %v1054_v27, %v252_v6  ;;  %v469_v21 = vadd.bf16 %v1054_v27, %v253_v7  ;;  %v351_v22 = vcombine.high %v786_v13, %v786_v13  ;;  %v265_v39 = vld [vmem:[%s1025_s23 + $0x258] sm:$0xff]  ;;  %v266_v41 = vld [vmem:[%s1025_s23 + $0x260] sm:$0xff] }
  0x4f   : > { %572 = vst [vmem:[%s1106_s20 + $0x130] sm:$0xff] %v444_v45  ;;  %573 = vst [vmem:[%s1106_s20 + $0x138] sm:$0xff] %v445_v46  ;;  %v358_v23 = vrot.slane %v786_v13, %v1031_v5  ;;  %v267_v42 = vld [vmem:[%s1025_s23 + $0x268] sm:$0xff]  ;;  %v268_v43 = vld [vmem:[%s1025_s23 + $0x270] sm:$0xff] }
  0x50   : > { %574 = vst [vmem:[%s1106_s20 + $0x140] sm:$0xff] %v446_v50  ;;  %575 = vst [vmem:[%s1106_s20 + $0x148] sm:$0xff] %v447_v51  ;;  %v365_v27 = vrot.slane %v351_v22, %v1031_v5  ;;  %v259_v5 = vld [vmem:[%s1025_s23 + $0x228] sm:$0xff]  ;;  %v1356_v44 = vld [vmem:[%s1025_s23 + $0x280] sm:$0xff] }
  0x51   : > { %576 = vst [vmem:[%s1106_s20 + $0x150] sm:$0xff] %v448_v52  ;;  %577 = vst [vmem:[%s1106_s20 + $0x158] sm:$0xff] %v449_v53  ;;  %v381_v24 = vpack.i.b16 %v358_v23, %v358_v23  ;;  %v1359_v45 = vld [vmem:[%s1025_s23 + $0x288] sm:$0xff]  ;;  %v1362_v46 = vld [vmem:[%s1025_s23 + $0x290] sm:$0xff] }
  0x52   : > { %578 = vst [vmem:[%s1106_s20 + $0x160] sm:$0xff] %v450_v57  ;;  %579 = vst [vmem:[%s1106_s20 + $0x168] sm:$0xff] %v451_v58  ;;  %v388_v26 = vpack.i.b16 %v365_v27, %v365_v27  ;;  %v1365_v47 = vld [vmem:[%s1025_s23 + $0x298] sm:$0xff]  ;;  %v1372_v52 = vld [vmem:[%s1025_s23 + $0x2a0] sm:$0xff] }
  0x53   : > { %580 = vst [vmem:[%s1106_s20 + $0x170] sm:$0xff] %v452_v59  ;;  %581 = vst [vmem:[%s1106_s20 + $0x178] sm:$0xff] %v453_v60  ;;  %v386_v25 = vrot.slane %v381_v24, %v1037_v9  ;;  %v1375_v53 = vld [vmem:[%s1025_s23 + $0x2a8] sm:$0xff]  ;;  %v1378_v54 = vld [vmem:[%s1025_s23 + $0x2b0] sm:$0xff] }
  0x54   : > { %582 = vst [vmem:[%s1106_s20 + $0x180] sm:$0xff] %v454_v0  ;;  %583 = vst [vmem:[%s1106_s20 + $0x188] sm:$0xff] %v455_v1  ;;  %v393_v32 = vrot.slane %v388_v26, %v1037_v9  ;;  %v269_v9 = vld [vmem:[%s1025_s23 + $0x278] sm:$0xff]  ;;  %v1388_v60 = vld [vmem:[%s1025_s23 + $0x2c0] sm:$0xff] }
  0x55   : > { %584 = vst [vmem:[%s1106_s20 + $0x190] sm:$0xff] %v456_v2  ;;  %585 = vst [vmem:[%s1106_s20 + $0x198] sm:$0xff] %v457_v3  ;;  %v1381_v55 = vld [vmem:[%s1025_s23 + $0x2b8] sm:$0xff]  ;;  %v1391_v61 = vld [vmem:[%s1025_s23 + $0x2c8] sm:$0xff] }
  0x56   : > { %586 = vst [vmem:[%s1106_s20 + $0x1a0] sm:$0xff] %v458_v8  ;;  %587 = vst [vmem:[%s1106_s20 + $0x1a8] sm:$0xff] %v459_v10  ;;  %v1349_v40 = vcombine.low %v386_v25, %v393_v32  ;;  %v1394_v62 = vld [vmem:[%s1025_s23 + $0x2d0] sm:$0xff]  ;;  %v1397_v63 = vld [vmem:[%s1025_s23 + $0x2d8] sm:$0xff] }
  0x57   : > { %588 = vst [vmem:[%s1106_s20 + $0x1b0] sm:$0xff] %v460_v11  ;;  %589 = vst [vmem:[%s1106_s20 + $0x1b8] sm:$0xff] %v461_v12  ;;  %v1408_v4 = vld [vmem:[%s1025_s23 + $0x2e0] sm:$0xff]  ;;  %v1411_v6 = vld [vmem:[%s1025_s23 + $0x2e8] sm:$0xff] }
  0x58   : > { %590 = vst [vmem:[%s1106_s20 + $0x1c0] sm:$0xff] %v462_v14  ;;  %591 = vst [vmem:[%s1106_s20 + $0x1c8] sm:$0xff] %v463_v15  ;;  %v470_v48 = vadd.bf16 %v1349_v40, %v254_v28  ;;  %v471_v49 = vadd.bf16 %v1349_v40, %v255_v29  ;;  %v472_v50 = vadd.bf16 %v1349_v40, %v256_v30  ;;  %v1414_v7 = vld [vmem:[%s1025_s23 + $0x2f0] sm:$0xff]  ;;  %v1417_v8 = vld [vmem:[%s1025_s23 + $0x2f8] sm:$0xff] }
  0x59   : > { %592 = vst [vmem:[%s1106_s20 + $0x1d0] sm:$0xff] %v464_v16  ;;  %593 = vst [vmem:[%s1106_s20 + $0x1d8] sm:$0xff] %v465_v17  ;;  %v473_v51 = vadd.bf16 %v1349_v40, %v257_v31  ;;  %v474_v56 = vadd.bf16 %v1349_v40, %v258_v33  ;;  %v475_v57 = vadd.bf16 %v1349_v40, %v259_v5  ;;  %v1428_v14 = vld [vmem:[%s1025_s23 + $0x300] sm:$0xff]  ;;  %v1431_v15 = vld [vmem:[%s1025_s23 + $0x308] sm:$0xff] }
  0x5a   : > { %594 = vst [vmem:[%s1106_s20 + $0x1e0] sm:$0xff] %v466_v18  ;;  %595 = vst [vmem:[%s1106_s20 + $0x1e8] sm:$0xff] %v467_v19  ;;  %v476_v58 = vadd.bf16 %v1349_v40, %v260_v34  ;;  %v477_v59 = vadd.bf16 %v1349_v40, %v261_v35  ;;  %v478_v0 = vadd.bf16 %v1349_v40, %v262_v36  ;;  %v1434_v16 = vld [vmem:[%s1025_s23 + $0x310] sm:$0xff]  ;;  %v1437_v17 = vld [vmem:[%s1025_s23 + $0x318] sm:$0xff] }
  0x5b   : > { %596 = vst [vmem:[%s1106_s20 + $0x1f0] sm:$0xff] %v468_v20  ;;  %597 = vst [vmem:[%s1106_s20 + $0x1f8] sm:$0xff] %v469_v21  ;;  %v479_v1 = vadd.bf16 %v1349_v40, %v263_v37  ;;  %v480_v2 = vadd.bf16 %v1349_v40, %v264_v38  ;;  %v481_v3 = vadd.bf16 %v1349_v40, %v265_v39  ;;  %v1452_v22 = vld [vmem:[%s1025_s23 + $0x320] sm:$0xff]  ;;  %v1455_v23 = vld [vmem:[%s1025_s23 + $0x328] sm:$0xff] }
  0x5c   : > { %598 = vst [vmem:[%s1106_s20 + $0x200] sm:$0xff] %v470_v48  ;;  %599 = vst [vmem:[%s1106_s20 + $0x208] sm:$0xff] %v471_v49  ;;  %v482_v10 = vadd.bf16 %v1349_v40, %v266_v41  ;;  %v483_v11 = vadd.bf16 %v1349_v40, %v267_v42  ;;  %v484_v12 = vadd.bf16 %v1349_v40, %v268_v43  ;;  %v1458_v27 = vld [vmem:[%s1025_s23 + $0x330] sm:$0xff]  ;;  %v1461_v24 = vld [vmem:[%s1025_s23 + $0x338] sm:$0xff] }
  0x5d   : > { %600 = vst [vmem:[%s1106_s20 + $0x210] sm:$0xff] %v472_v50  ;;  %601 = vst [vmem:[%s1106_s20 + $0x218] sm:$0xff] %v473_v51  ;;  %v485_v13 = vadd.bf16 %v1349_v40, %v269_v9  ;;  %v486_v18 = vadd.bf16 %v1349_v40, %v1356_v44  ;;  %v487_v19 = vadd.bf16 %v1349_v40, %v1359_v45  ;;  %v1476_v30 = vld [vmem:[%s1025_s23 + $0x340] sm:$0xff]  ;;  %v1479_v31 = vld [vmem:[%s1025_s23 + $0x348] sm:$0xff] }
  0x5e   : > { %602 = vst [vmem:[%s1106_s20 + $0x220] sm:$0xff] %v474_v56  ;;  %603 = vst [vmem:[%s1106_s20 + $0x228] sm:$0xff] %v475_v57  ;;  %v488_v20 = vadd.bf16 %v1349_v40, %v1362_v46  ;;  %v489_v21 = vadd.bf16 %v1349_v40, %v1365_v47  ;;  %v490_v25 = vadd.bf16 %v1349_v40, %v1372_v52  ;;  %v1482_v32 = vld [vmem:[%s1025_s23 + $0x350] sm:$0xff]  ;;  %v297_v36 = vld [vmem:[%s1025_s23 + $0x358] sm:$0xff] }
  0x5f   : > { %604 = vst [vmem:[%s1106_s20 + $0x230] sm:$0xff] %v476_v58  ;;  %605 = vst [vmem:[%s1106_s20 + $0x238] sm:$0xff] %v477_v59  ;;  %v491_v26 = vadd.bf16 %v1349_v40, %v1375_v53  ;;  %v492_v28 = vadd.bf16 %v1349_v40, %v1378_v54  ;;  %v493_v29 = vadd.bf16 %v1349_v40, %v1381_v55  ;;  %v1498_v37 = vld [vmem:[%s1025_s23 + $0x360] sm:$0xff]  ;;  %v1501_v38 = vld [vmem:[%s1025_s23 + $0x368] sm:$0xff] }
  0x60   : > { %606 = vst [vmem:[%s1106_s20 + $0x240] sm:$0xff] %v478_v0  ;;  %607 = vst [vmem:[%s1106_s20 + $0x248] sm:$0xff] %v479_v1  ;;  %v494_v33 = vadd.bf16 %v1349_v40, %v1388_v60  ;;  %v495_v5 = vadd.bf16 %v1349_v40, %v1391_v61  ;;  %v496_v34 = vadd.bf16 %v1349_v40, %v1394_v62  ;;  %v300_v9 = vld [vmem:[%s1025_s23 + $0x370] sm:$0xff]  ;;  %v301_v44 = vld [vmem:[%s1025_s23 + $0x378] sm:$0xff] }
  0x61   : > { %608 = vst [vmem:[%s1106_s20 + $0x250] sm:$0xff] %v480_v2  ;;  %609 = vst [vmem:[%s1106_s20 + $0x258] sm:$0xff] %v481_v3  ;;  %v497_v35 = vadd.bf16 %v1349_v40, %v1397_v63  ;;  %v498_v39 = vadd.bf16 %v1349_v40, %v1408_v4  ;;  %v499_v41 = vadd.bf16 %v1349_v40, %v1411_v6  ;;  %v1518_v45 = vld [vmem:[%s1025_s23 + $0x380] sm:$0xff]  ;;  %v303_v50 = vld [vmem:[%s1025_s23 + $0x388] sm:$0xff] }
  0x62   : > { %610 = vst [vmem:[%s1106_s20 + $0x260] sm:$0xff] %v482_v10  ;;  %611 = vst [vmem:[%s1106_s20 + $0x268] sm:$0xff] %v483_v11  ;;  %v500_v42 = vadd.bf16 %v1349_v40, %v1414_v7  ;;  %v501_v43 = vadd.bf16 %v1349_v40, %v1417_v8  ;;  %v502_v46 = vadd.bf16 %v1349_v40, %v1428_v14  ;;  %v304_v51 = vld [vmem:[%s1025_s23 + $0x390] sm:$0xff]  ;;  %v305_v52 = vld [vmem:[%s1025_s23 + $0x398] sm:$0xff] }
  0x63   : > { %612 = vst [vmem:[%s1106_s20 + $0x270] sm:$0xff] %v484_v12  ;;  %613 = vst [vmem:[%s1106_s20 + $0x278] sm:$0xff] %v485_v13  ;;  %v503_v47 = vadd.bf16 %v1349_v40, %v1431_v15  ;;  %v504_v48 = vadd.bf16 %v1349_v40, %v1434_v16  ;;  %v505_v49 = vadd.bf16 %v1349_v40, %v1437_v17  ;;  %v306_v57 = vld [vmem:[%s1025_s23 + $0x3a0] sm:$0xff]  ;;  %v307_v58 = vld [vmem:[%s1025_s23 + $0x3a8] sm:$0xff] }
  0x64   : > { %614 = vst [vmem:[%s1106_s20 + $0x280] sm:$0xff] %v486_v18  ;;  %615 = vst [vmem:[%s1106_s20 + $0x288] sm:$0xff] %v487_v19  ;;  %v506_v53 = vadd.bf16 %v1349_v40, %v1452_v22  ;;  %v507_v54 = vadd.bf16 %v1349_v40, %v1455_v23  ;;  %v508_v55 = vadd.bf16 %v1349_v40, %v1458_v27  ;;  %v308_v59 = vld [vmem:[%s1025_s23 + $0x3b0] sm:$0xff]  ;;  %v309_v0 = vld [vmem:[%s1025_s23 + $0x3b8] sm:$0xff] }
  0x65   : > { %616 = vst [vmem:[%s1106_s20 + $0x290] sm:$0xff] %v488_v20  ;;  %617 = vst [vmem:[%s1106_s20 + $0x298] sm:$0xff] %v489_v21  ;;  %v509_v56 = vadd.bf16 %v1349_v40, %v1461_v24  ;;  %v510_v60 = vadd.bf16 %v1349_v40, %v1476_v30  ;;  %v511_v61 = vadd.bf16 %v1349_v40, %v1479_v31  ;;  %v310_v1 = vld [vmem:[%s1025_s23 + $0x3c0] sm:$0xff]  ;;  %v311_v2 = vld [vmem:[%s1025_s23 + $0x3c8] sm:$0xff] }
  0x66   : > { %618 = vst [vmem:[%s1106_s20 + $0x2a0] sm:$0xff] %v490_v25  ;;  %619 = vst [vmem:[%s1106_s20 + $0x2a8] sm:$0xff] %v491_v26  ;;  %v512_v62 = vadd.bf16 %v1349_v40, %v1482_v32  ;;  %v513_v63 = vadd.bf16 %v1349_v40, %v297_v36  ;;  %v514_v3 = vadd.bf16 %v1349_v40, %v1498_v37  ;;  %v312_v8 = vld [vmem:[%s1025_s23 + $0x3d0] sm:$0xff]  ;;  %v313_v10 = vld [vmem:[%s1025_s23 + $0x3d8] sm:$0xff] }
  0x67   : > { %620 = vst [vmem:[%s1106_s20 + $0x2b0] sm:$0xff] %v492_v28  ;;  %621 = vst [vmem:[%s1106_s20 + $0x2b8] sm:$0xff] %v493_v29  ;;  %v515_v4 = vadd.bf16 %v1349_v40, %v1501_v38  ;;  %v516_v6 = vadd.bf16 %v1349_v40, %v300_v9  ;;  %v517_v7 = vadd.bf16 %v1349_v40, %v301_v44  ;;  %v314_v11 = vld [vmem:[%s1025_s23 + $0x3e0] sm:$0xff]  ;;  %v315_v16 = vld [vmem:[%s1025_s23 + $0x3e8] sm:$0xff] }
  0x68   : > { %622 = vst [vmem:[%s1106_s20 + $0x2c0] sm:$0xff] %v494_v33  ;;  %623 = vst [vmem:[%s1106_s20 + $0x2c8] sm:$0xff] %v495_v5  ;;  %v518_v12 = vadd.bf16 %v1349_v40, %v1518_v45  ;;  %v519_v13 = vadd.bf16 %v1349_v40, %v303_v50  ;;  %v520_v14 = vadd.bf16 %v1349_v40, %v304_v51  ;;  %v316_v17 = vld [vmem:[%s1025_s23 + $0x3f0] sm:$0xff]  ;;  %v317_v18 = vld [vmem:[%s1025_s23 + $0x3f8] sm:$0xff] }
  0x69   : > { %624 = vst [vmem:[%s1106_s20 + $0x2d0] sm:$0xff] %v496_v34  ;;  %625 = vst [vmem:[%s1106_s20 + $0x2d8] sm:$0xff] %v497_v35  ;;  %v521_v15 = vadd.bf16 %v1349_v40, %v305_v52  ;;  %v522_v19 = vadd.bf16 %v1349_v40, %v306_v57  ;;  %v523_v20 = vadd.bf16 %v1349_v40, %v307_v58 }
  0x6a   : > { %626 = vst [vmem:[%s1106_s20 + $0x2e0] sm:$0xff] %v498_v39  ;;  %627 = vst [vmem:[%s1106_s20 + $0x2e8] sm:$0xff] %v499_v41  ;;  %v524_v21 = vadd.bf16 %v1349_v40, %v308_v59  ;;  %v525_v22 = vadd.bf16 %v1349_v40, %v309_v0  ;;  %v526_v23 = vadd.bf16 %v1349_v40, %v310_v1 }
  0x6b   : > { %628 = vst [vmem:[%s1106_s20 + $0x2f0] sm:$0xff] %v500_v42  ;;  %629 = vst [vmem:[%s1106_s20 + $0x2f8] sm:$0xff] %v501_v43  ;;  %v527_v27 = vadd.bf16 %v1349_v40, %v311_v2  ;;  %v528_v24 = vadd.bf16 %v1349_v40, %v312_v8  ;;  %v529_v25 = vadd.bf16 %v1349_v40, %v313_v10 }
  0x6c   : > { %630 = vst [vmem:[%s1106_s20 + $0x300] sm:$0xff] %v502_v46  ;;  %631 = vst [vmem:[%s1106_s20 + $0x308] sm:$0xff] %v503_v47  ;;  %v530_v26 = vadd.bf16 %v1349_v40, %v314_v11  ;;  %v531_v28 = vadd.bf16 %v1349_v40, %v315_v16  ;;  %v532_v29 = vadd.bf16 %v1349_v40, %v316_v17 }
  0x6d   : > { %632 = vst [vmem:[%s1106_s20 + $0x310] sm:$0xff] %v504_v48  ;;  %633 = vst [vmem:[%s1106_s20 + $0x318] sm:$0xff] %v505_v49  ;;  %v533_v30 = vadd.bf16 %v1349_v40, %v317_v18 }
  0x6e   : > { %634 = vst [vmem:[%s1106_s20 + $0x320] sm:$0xff] %v506_v53  ;;  %635 = vst [vmem:[%s1106_s20 + $0x328] sm:$0xff] %v507_v54 }
  0x6f   : > { %636 = vst [vmem:[%s1106_s20 + $0x330] sm:$0xff] %v508_v55  ;;  %637 = vst [vmem:[%s1106_s20 + $0x338] sm:$0xff] %v509_v56 }
  0x70   : > { %638 = vst [vmem:[%s1106_s20 + $0x340] sm:$0xff] %v510_v60  ;;  %639 = vst [vmem:[%s1106_s20 + $0x348] sm:$0xff] %v511_v61 }
  0x71   : > { %640 = vst [vmem:[%s1106_s20 + $0x350] sm:$0xff] %v512_v62  ;;  %641 = vst [vmem:[%s1106_s20 + $0x358] sm:$0xff] %v513_v63 }
  0x72   : > { %642 = vst [vmem:[%s1106_s20 + $0x360] sm:$0xff] %v514_v3  ;;  %643 = vst [vmem:[%s1106_s20 + $0x368] sm:$0xff] %v515_v4 }
  0x73   : > { %644 = vst [vmem:[%s1106_s20 + $0x370] sm:$0xff] %v516_v6  ;;  %645 = vst [vmem:[%s1106_s20 + $0x378] sm:$0xff] %v517_v7 }
  0x74   : > { %646 = vst [vmem:[%s1106_s20 + $0x380] sm:$0xff] %v518_v12  ;;  %647 = vst [vmem:[%s1106_s20 + $0x388] sm:$0xff] %v519_v13 }
  0x75   : > { %648 = vst [vmem:[%s1106_s20 + $0x390] sm:$0xff] %v520_v14  ;;  %649 = vst [vmem:[%s1106_s20 + $0x398] sm:$0xff] %v521_v15 }
  0x76   : > { %650 = vst [vmem:[%s1106_s20 + $0x3a0] sm:$0xff] %v522_v19  ;;  %651 = vst [vmem:[%s1106_s20 + $0x3a8] sm:$0xff] %v523_v20 }
  0x77   : > { %652 = vst [vmem:[%s1106_s20 + $0x3b0] sm:$0xff] %v524_v21  ;;  %653 = vst [vmem:[%s1106_s20 + $0x3b8] sm:$0xff] %v525_v22 }
  0x78   : > { %654 = vst [vmem:[%s1106_s20 + $0x3c0] sm:$0xff] %v526_v23  ;;  %655 = vst [vmem:[%s1106_s20 + $0x3c8] sm:$0xff] %v527_v27 }
  0x79   : > { %656 = vst [vmem:[%s1106_s20 + $0x3d0] sm:$0xff] %v528_v24  ;;  %657 = vst [vmem:[%s1106_s20 + $0x3d8] sm:$0xff] %v529_v25 }
  0x7a   : > { %658 = vst [vmem:[%s1106_s20 + $0x3e0] sm:$0xff] %v530_v26  ;;  %659 = vst [vmem:[%s1106_s20 + $0x3e8] sm:$0xff] %v531_v28 }
  0x7b   : > { %660 = vst [vmem:[%s1106_s20 + $0x3f0] sm:$0xff] %v532_v29  ;;  %661 = vst [vmem:[%s1106_s20 + $0x3f8] sm:$0xff] %v533_v30 }
  0x7c   : > { %s798_s5 = sshll.u32 %s957_s13, 13  ;;  %s687_s6 = sshll.u32 %s1106_s20, 4  ;;  %s688_s6 = int_to_ptr.vmem [resolvable:$true] %s687_s6 }
  0x7d   : > { %s676_s14 = scalar_lea.hbm %s1661_s2, %s798_s5  ;;  %s914_s16 = smov 8192  }
  0x7e   : > { %808 = sst [smem:[#allocation9]] (%p984_p9), %s914_s16  ;;  %s915_s17 = smov 16384  }
  0x7f   : > { %809 = sst [smem:[#allocation9 + $0x1]] (%p984_p9), %s915_s17  ;;  %s916_s24 = smov 64  }
  0x80   : > { %810 = sst [smem:[#allocation9 + $0x2]] (%p984_p9), %s916_s24  ;;  %s917_s25 = smov 128  }
  0x81   : > { %811 = sst [smem:[#allocation9 + $0x3]] (%p984_p9), %s917_s25  ;;  %s918_s13 = smov 8  }
  0x82   : > { %812 = sst [smem:[#allocation9 + $0x4]] (%p984_p9), %s917_s25  ;;  %s919_s26 = smov 131072  }
  0x83   : > { %813 = sst [smem:[#allocation9 + $0x5]] (%p984_p9), %s918_s13  ;;  %s920_s27 = smov 0  }
  0x84   : > { %814 = dma.general (%p984_p9), %s688_s6, 16384, %s676_s14, %s663_s4, %s919_s26, [#allocation9], %s920_s27, 0  }
  0x85 PF: > { %s715_s29 = sand.u32 1, %s893_s9   ;;  %p817_p1 = pnand %p775_p11, %p988_p10 }
  0x86   : > { %s716_s23 = scalar_lea.sflag [#allocation4], %s715_s29 }
  0x87   : > { %p818_p2 = pneg %p817_p1 }
  0x89   : > { %888 = dma.done.wait (%p818_p2), %s716_s23, 16384  }
  0x8a   : > { %890 = vsyncadd (%p818_p2), %s716_s23, 4294950912  ;;  %p15_p3 = scmp.ge.s32.totalorder %s961_s15, 4   ;;  %s1666_s9 = smov %s897_s10 }
  0x8b   : > { %s1667_s10 = smov %s901_s11  ;;  %s1668_s11 = smov %s973_s18 }
  0x8c   : > { %s1669_s12 = smov %s961_s15  ;;  %17 = sbr.rel (!%p15_p3) target bundleno = 5 (0x5), region = 83 }
  0x91   :  { %721 = vsyncpa [#allocation3], 1 }
  0x92   :  { %723 = vsyncpa [#allocation3 + $0x1], 1 }
  0x93   :  { %724 = vsyncpa [#allocation4], 1 }
  0x94   :  { %726 = vsyncpa [#allocation4 + $0x1], 1 }

</bundles_post_ra>
